<compile_context>
chip_gen: v5e
topology: v5e:2x2
jax: 0.10.0
libtpu: 0.0.40
codegen_flags: <defaults>
</compile_context>

<pallas_src>
import functools

import jax
import jax.numpy as jnp
from jax.experimental import pallas as pl
from jax.experimental.pallas import tpu as pltpu


# ----------------------------------------------------------------------------
# Kernel
# ----------------------------------------------------------------------------
def _bce_kernel(x_ref, t_ref, m_ref, o_ref, acc_ref, *, inv_len, lane_groups):
    k = pl.program_id(1)

    @pl.when(k == 0)
    def _():
        acc_ref[...] = jnp.zeros_like(acc_ref)

    x = x_ref[...].astype(jnp.float32)
    t = t_ref[...].astype(jnp.float32)
    m = m_ref[...].astype(jnp.float32)

    # Numerically stable BCE-with-logits (matches torch BCEWithLogits):
    #   max(x, 0) - x*t + log1p(exp(-|x|)),   weighted by mask.
    loss = (jnp.maximum(x, 0.0) - x * t + jnp.log1p(jnp.exp(-jnp.abs(x)))) * m

    # Lane-dense accumulation: fold the tile_L lanes into a single 128-lane group
    # with plain VPU adds on full vregs (128-aligned static slices are vreg picks).
    partial = loss[:, 0:128]
    for g in range(1, lane_groups):
        partial = partial + loss[:, g * 128:(g + 1) * 128]
    acc_ref[...] += partial

    @pl.when(k == pl.num_programs(1) - 1)
    def _():
        # Single cross-lane reduce per batch block; mean over dim=1 == sum / L.
        o_ref[...] = jnp.sum(acc_ref[...], axis=1, keepdims=True) * inv_len


# ----------------------------------------------------------------------------
# Tiling helpers
# ----------------------------------------------------------------------------
_MAX_TILE_L = 2048


def _round_up(x, m):
    return ((x + m - 1) // m) * m


def _sublane_multiple(dtype) -> int:
    # Sub-32-bit dtypes pack along sublanes: f32 -> 8, bf16 -> 16, int8 -> 32.
    return {4: 8, 2: 16, 1: 32}.get(jnp.dtype(dtype).itemsize, 8)


def _vmem_capacity_bytes() -> int:
    try:
        return int(pltpu.get_tpu_info().vmem_capacity_bytes)
    except Exception:
        return 64 * 1024 * 1024  # conservative (v7x physical VMEM per TC)


def _pick_tile_L(L):
    """Multiple of 128; prefers large divisors of the 128-rounded L, else 512."""
    L128 = _round_up(L, 128)
    if L128 <= _MAX_TILE_L:
        return L128
    for c in range(_MAX_TILE_L, 511, -128):
        if L128 % c == 0:
            return c
    return 512  # wrapper pads L up to a multiple of 512


def _pick_tiles(B, L, dtypes, vmem_phys):
    req = max(8, max(_sublane_multiple(d) for d in dtypes))
    tile_L = _pick_tile_L(L)

    itemsize_sum = sum(jnp.dtype(d).itemsize for d in dtypes)
    # Generation-aware per-input block target (f32-equivalent):
    #   ~4 MiB on 128 MiB-VMEM chips (v5e/v6e), ~2 MiB on 64 MiB parts (v7x).
    target_block_bytes = (4 << 20) if vmem_phys >= (96 << 20) else (2 << 20)
    target_rows = max(req, target_block_bytes // (4 * tile_L))
    # VMEM budget: 3 double-buffered inputs + the (tile_b, 128) f32 accumulator.
    budget_rows = max(req, int(vmem_phys * 0.5) // (2 * itemsize_sum * tile_L + 4 * 128))

    tile_b = min(target_rows, budget_rows)
    tile_b = max(req, (tile_b // req) * req)
    tile_b = min(tile_b, _round_up(B, req))
    # Keep >= 2 blocks on the "parallel" batch axis so both v7x TCs get work
    # (harmless on single-TC v5e/v6e).
    if B > req:
        tile_b = min(tile_b, _round_up((B + 1) // 2, req))
    return tile_b, tile_L, req


# ----------------------------------------------------------------------------
# Wrapper
# ----------------------------------------------------------------------------
def sigmoid_bce_loss(inputs, targets, mask, *, tile_b=None, tile_L=None):
    """BCEWithLogits(weight=mask, reduction='none').mean(dim=1) as a Pallas kernel.

    inputs / targets / mask: (B, L). Any float/int dtypes accepted; math is f32
    in-kernel. Recommended (bandwidth-optimal) calling convention for this
    HBM-bound kernel: bf16 inputs + bf16 targets + int8 mask (5 B/elem vs 12).
    Non-0/1 mask values act as per-element weights (same as torch `weight=`).
    Returns float32 of shape (B,).
    """
    B, L = inputs.shape
    assert targets.shape == (B, L) and mask.shape == (B, L)

    dtypes = (inputs.dtype, targets.dtype, mask.dtype)
    vmem_phys = _vmem_capacity_bytes()
    auto_b, auto_L, req = _pick_tiles(B, L, dtypes, vmem_phys)
    if tile_L is None:
        tile_L = auto_L
    assert tile_L % 128 == 0, "tile_L must be a multiple of 128"
    if tile_b is None:
        tile_b = auto_b
    tile_b = _round_up(tile_b, req)

    # Zero-pad so blocks tile exactly. Padded mask entries are 0 so they add
    # nothing; inv_len stays 1/original_L; padded batch rows are sliced off.
    L_pad = _round_up(L, tile_L)
    B_pad = _round_up(B, tile_b)
    if (B_pad, L_pad) != (B, L):
        pad = ((0, B_pad - B), (0, L_pad - L))
        inputs = jnp.pad(inputs, pad)
        targets = jnp.pad(targets, pad)
        mask = jnp.pad(mask, pad)

    grid = (B_pad // tile_b, L_pad // tile_L)
    kernel = functools.partial(
        _bce_kernel, inv_len=float(1.0 / L), lane_groups=tile_L // 128
    )

    itemsize_sum = sum(jnp.dtype(d).itemsize for d in dtypes)
    # Deeper input pipelining for small blocks on big-VMEM chips (v5e/v6e only).
    buffers = 3 if (vmem_phys >= (96 << 20) and tile_b * tile_L * 4 <= (2 << 20)) else 2

    resident = buffers * tile_b * tile_L * itemsize_sum + tile_b * (128 + 2) * 4
    frac = 0.9 if vmem_phys >= (96 << 20) else 0.75
    vmem_limit = int(min(frac * vmem_phys, max(resident + (8 << 20), 32 << 20)))

    cost = pl.CostEstimate(
        flops=9 * B_pad * L_pad,
        transcendentals=2 * B_pad * L_pad,
        bytes_accessed=B_pad * L_pad * itemsize_sum + 4 * B_pad,
    )

    def call(in_specs):
        return pl.pallas_call(
            kernel,
            out_shape=jax.ShapeDtypeStruct((B_pad, 1), jnp.float32),
            grid=grid,
            in_specs=in_specs,
            out_specs=pl.BlockSpec((tile_b, 1), lambda i, k: (i, 0)),
            scratch_shapes=[pltpu.VMEM((tile_b, 128), jnp.float32)],
            compiler_params=pltpu.CompilerParams(
                dimension_semantics=("parallel", "arbitrary"),
                vmem_limit_bytes=vmem_limit,
            ),
            cost_estimate=cost,
        )(inputs, targets, mask)

    idx = lambda i, k: (i, k)
    default_specs = [pl.BlockSpec((tile_b, tile_L), idx) for _ in range(3)]
    if buffers > 2:
        try:
            deep_specs = [
                pl.BlockSpec((tile_b, tile_L), idx, pipeline_mode=pl.Buffered(buffers))
                for _ in range(3)
            ]
            out = call(deep_specs)
        except Exception:
            out = call(default_specs)  # older jax without pipeline_mode support
    else:
        out = call(default_specs)

    return out[:B, 0]


# ----------------------------------------------------------------------------
# Pure-JAX reference (mirrors the PyTorch module)
# ----------------------------------------------------------------------------
def _reference(inputs, targets, mask):
    x = inputs.astype(jnp.float32)
    t = targets.astype(jnp.float32)
    m = mask.astype(jnp.float32)
    loss = jnp.maximum(x, 0.0) - x * t + jnp.log1p(jnp.exp(-jnp.abs(x)))
    return jnp.mean(loss * m, axis=1)


if __name__ == "__main__":
    key = jax.random.PRNGKey(0)
    k1, k2, k3 = jax.random.split(key, 3)

    # Small word2vec-CBOW-like shapes: (batch_size, len)
    B, L = 16, 60  # L not a multiple of 128 -> exercises the padding path
    inputs = jax.random.normal(k1, (B, L), dtype=jnp.float32) * 2.0
    targets = (jax.random.uniform(k2, (B, L)) > 0.5).astype(jnp.float32)
    mask = (jax.random.uniform(k3, (B, L)) > 0.2).astype(jnp.float32)

    ref = _reference(inputs, targets, mask)

    # 1) auto-tiled f32 path (padded L, >=2 batch blocks)
    out = jax.block_until_ready(sigmoid_bce_loss(inputs, targets, mask))
    assert out.shape == (B,)
    assert jnp.allclose(out, ref, atol=1e-5, rtol=1e-4)

    # 2) recommended narrow-dtype path: bf16 logits/targets + int8 mask
    x_bf = inputs.astype(jnp.bfloat16)
    t_bf = targets.astype(jnp.bfloat16)
    m_i8 = mask.astype(jnp.int8)
    out2 = jax.block_until_ready(sigmoid_bce_loss(x_bf, t_bf, m_i8))
    ref2 = _reference(x_bf, t_bf, m_i8)
    assert jnp.allclose(out2, ref2, atol=1e-5, rtol=1e-4)

    # 3) forced multi-step grid: exercises the L-axis accumulator and
    #    lane-group folding (lane_groups=2), grid = (2, 2)
    k4, k5, k6 = jax.random.split(jax.random.PRNGKey(1), 3)
    B2, L2 = 16, 512
    x2 = jax.random.normal(k4, (B2, L2), dtype=jnp.float32) * 2.0
    t2 = (jax.random.uniform(k5, (B2, L2)) > 0.5).astype(jnp.float32)
    m2 = (jax.random.uniform(k6, (B2, L2)) > 0.2).astype(jnp.float32)
    out3 = jax.block_until_ready(
        sigmoid_bce_loss(x2, t2, m2, tile_b=8, tile_L=256)
    )
    assert jnp.allclose(out3, _reference(x2, t2, m2), atol=1e-5, rtol=1e-4)

    print("KERNEL_OK")
</pallas_src>

<mosaic_0001>
module attributes {stable_mosaic.version = 11 : i64} {
  func.func @_bce_kernel(%arg0: i32, %arg1: i32, %arg2: memref<8x128xf32, #tpu.memory_space<vmem>>, %arg3: memref<8x128xf32, #tpu.memory_space<vmem>>, %arg4: memref<8x128xf32, #tpu.memory_space<vmem>>, %arg5: memref<8x1xf32, #tpu.memory_space<vmem>>, %arg6: memref<8x128xf32, #tpu.memory_space<vmem>>) attributes {dimension_semantics = [#tpu.dimension_semantics<parallel>, #tpu.dimension_semantics<arbitrary>], iteration_bounds = array<i64: 2, 1>, scalar_prefetch = 0 : i64, scratch_operands = 1 : i64, tpu.core_type = #tpu.core_type<tc>, window_params = [{transform_indices = @transform_0, window_bounds = array<i64: 8, 128>}, {transform_indices = @transform_1, window_bounds = array<i64: 8, 128>}, {transform_indices = @transform_2, window_bounds = array<i64: 8, 128>}, {transform_indices = @transform_3, window_bounds = array<i64: 8, 1>}]} {
    %c0_i32 = arith.constant 0 : i32
    %0 = arith.cmpi eq, %arg1, %c0_i32 : i32
    %1 = arith.extui %0 : i1 to i32
    %c0_i32_0 = arith.constant 0 : i32
    %2 = arith.cmpi ne, %1, %c0_i32_0 : i32
    scf.if %2 {
      %cst_13 = arith.constant 0.000000e+00 : f32
      %23 = vector.broadcast %cst_13 : f32 to vector<8x128xf32>
      %c0_14 = arith.constant 0 : index
      %c0_15 = arith.constant 0 : index
      %24 = vector.load %arg6[%c0_14, %c0_15] : memref<8x128xf32, #tpu.memory_space<vmem>>, vector<8x128xf32>
      tpu.vector_store %arg6[%c0_14, %c0_15], %23 {strides = array<i32>} : memref<8x128xf32, #tpu.memory_space<vmem>>, vector<8x128xf32>,
    } else {
    }
    %c0 = arith.constant 0 : index
    %c0_1 = arith.constant 0 : index
    %3 = vector.load %arg2[%c0, %c0_1] : memref<8x128xf32, #tpu.memory_space<vmem>>, vector<8x128xf32>
    %c0_2 = arith.constant 0 : index
    %c0_3 = arith.constant 0 : index
    %4 = vector.load %arg3[%c0_2, %c0_3] : memref<8x128xf32, #tpu.memory_space<vmem>>, vector<8x128xf32>
    %c0_4 = arith.constant 0 : index
    %c0_5 = arith.constant 0 : index
    %5 = vector.load %arg4[%c0_4, %c0_5] : memref<8x128xf32, #tpu.memory_space<vmem>>, vector<8x128xf32>
    %cst = arith.constant 0.000000e+00 : f32
    %6 = vector.broadcast %cst : f32 to vector<8x128xf32>
    %7 = arith.maximumf %3, %6 : vector<8x128xf32>
    %8 = arith.mulf %3, %4 : vector<8x128xf32>
    %9 = arith.subf %7, %8 : vector<8x128xf32>
    %10 = math.absf %3 : vector<8x128xf32>
    %cst_6 = arith.constant 0.000000e+00 : f32
    %11 = vector.broadcast %cst_6 : f32 to vector<8x128xf32>
    %12 = arith.subf %11, %10 : vector<8x128xf32>
    %13 = math.exp %12 : vector<8x128xf32>
    %14 = math.log1p %13 : vector<8x128xf32>
    %15 = arith.addf %9, %14 : vector<8x128xf32>
    %16 = arith.mulf %15, %5 : vector<8x128xf32>
    %c0_7 = arith.constant 0 : index
    %c0_8 = arith.constant 0 : index
    %17 = vector.load %arg6[%c0_7, %c0_8] : memref<8x128xf32, #tpu.memory_space<vmem>>, vector<8x128xf32>
    %18 = arith.addf %17, %16 : vector<8x128xf32>
    %c0_9 = arith.constant 0 : index
    %c0_10 = arith.constant 0 : index
    %19 = vector.load %arg6[%c0_9, %c0_10] : memref<8x128xf32, #tpu.memory_space<vmem>>, vector<8x128xf32>
    tpu.vector_store %arg6[%c0_9, %c0_10], %18 {strides = array<i32>} : memref<8x128xf32, #tpu.memory_space<vmem>>, vector<8x128xf32>,
    %c0_i32_11 = arith.constant 0 : i32
    %20 = arith.cmpi eq, %arg1, %c0_i32_11 : i32
    %21 = arith.extui %20 : i1 to i32
    %c0_i32_12 = arith.constant 0 : i32
    %22 = arith.cmpi ne, %21, %c0_i32_12 : i32
    scf.if %22 {
      %c0_13 = arith.constant 0 : index
      %c0_14 = arith.constant 0 : index
      %23 = vector.load %arg6[%c0_13, %c0_14] : memref<8x128xf32, #tpu.memory_space<vmem>>, vector<8x128xf32>
      %cst_15 = arith.constant dense<0.000000e+00> : vector<8xf32>
      %24 = vector.multi_reduction <add>, %23, %cst_15 [1] : vector<8x128xf32> to vector<8xf32>
      %25 = vector.shape_cast %24 : vector<8xf32> to vector<8x1xf32>
      %cst_16 = arith.constant 0.0166666675 : f32
      %26 = vector.broadcast %cst_16 : f32 to vector<8x1xf32>
      %27 = arith.mulf %25, %26 : vector<8x1xf32>
      %c0_17 = arith.constant 0 : index
      %c0_18 = arith.constant 0 : index
      %28 = vector.load %arg5[%c0_17, %c0_18] : memref<8x1xf32, #tpu.memory_space<vmem>>, vector<8x1xf32>
      tpu.vector_store %arg5[%c0_17, %c0_18], %27 {strides = array<i32>} : memref<8x1xf32, #tpu.memory_space<vmem>>, vector<8x1xf32>,
    } else {
    }
    return
  }
  func.func @transform_0(%arg0: i32, %arg1: i32) -> (i32, i32) {
    %c0_i32 = arith.constant 0 : i32
    return %arg0, %arg1 : i32, i32
  }
  func.func @transform_1(%arg0: i32, %arg1: i32) -> (i32, i32) {
    %c0_i32 = arith.constant 0 : i32
    return %arg0, %arg1 : i32, i32
  }
  func.func @transform_2(%arg0: i32, %arg1: i32) -> (i32, i32) {
    %c0_i32 = arith.constant 0 : i32
    return %arg0, %arg1 : i32, i32
  }
  func.func @transform_3(%arg0: i32, %arg1: i32) -> (i32, i32) {
    %c0_i32 = arith.constant 0 : i32
    %c0_i32_0 = arith.constant 0 : i32
    return %arg0, %c0_i32 : i32, i32
  }
}

</mosaic_0001>

<bundles_post_ra>
// kernel: tpu_custom_call.1
= control target key start
LH: loop header
LB: loop body
LE: loop exit
PB: predicated region body
PF: predicated region fallthrough
CT: control target
= control target key end

     0   :  { %8 = vsyncpa [#allocation4], 0  ;;  %s811_s0 = inlined_call_operand.hbm [shape: f32[16,128], index: 0, kind: input, shape index: {}]   ;;  %s812_s1 = inlined_call_operand.hbm [shape: f32[16,128], index: 1, kind: input, shape index: {}]   ;;  %s813_s2 = inlined_call_operand.hbm [shape: f32[16,128], index: 2, kind: input, shape index: {}]   ;;  %s814_s3 = inlined_call_operand.vmem [shape: f32[16,1], index: 3, kind: output, shape index: {}]  }
   0x1   :  { %10 = vsyncpa [#allocation4 + $0x1], 0 }
   0x2   :  { %11 = vsyncpa [#allocation6], 0 }
   0x3   :  { %13 = vsyncpa [#allocation6 + $0x1], 0  ;;  %s693_s12 = smov 0   ;;  %s695_s13 = smov 0  }
   0x4   :  { %s697_s14 = smov 0   ;;  %s699_s15 = smov 0  }
   0x5   :  { %s701_s16 = smov 0   ;;  %s703_s17 = smov 0  }
   0x6 LB: > { %s815_s18 = sadd.s32 4294967295, %s671_s17   ;;  %s31_s19 = sadd.s32 1, %s667_s16  ;;  %s671_s17 = sphi %s703_s17, %s19_s17   ;;  %s667_s16 = sphi %s701_s16, %s824_s16   ;;  %s663_s15 = sphi %s699_s15, %s823_s15   ;;  %s659_s14 = sphi %s697_s14, %s822_s14   ;;  %s655_s13 = sphi %s695_s13, %s821_s13   ;;  %s651_s12 = sphi %s693_s12, %s820_s12  }
   0x7   : > { %p33_p0 = scmp.ge.s32.totalorder %s31_s19, 2  ;;  %s40_s20 = sadd.s32 1, %s659_s14 }
   0x8   : > { %p47_p1 = scmp.ne.s32.totalorder %s659_s14, %s655_s13  ;;  %p48_p2 = scmp.eq.s32.totalorder %s671_s17, 0 }
   0x9   : > { %s826_s19 = smov (%p33_p0, %s31_s19), 0  ;;  %p53_p4 = scmp.ne.s32.totalorder %s655_s13, %s651_s12 }
   0xa   : > { %p49_p3 = por %p48_p2, %p47_p1  ;;  %s35_s21 = ssub.s32 %s667_s16, %s826_s19 }
   0xb   : > { %p54_p5 = scmp.eq.s32.totalorder %s815_s18, 0  ;;  %p38_p6 = scmp.eq.s32.totalorder %s35_s21, 0 }
   0xc   : > { %p474_p8 = scmp.lt.s32.totalorder %s671_s17, 2  ;;  %s159_s24 = sand.u32 1, %s659_s14  }
   0xd   : > { %p734_p7 = por %p54_p5, %p53_p4  ;;  %s446_s25 = sshll.u32 %s667_s16, 3 }
   0xe   : > { %s740_s23 = scalar_select %p38_p6, %s659_s14, %s40_s20  }
   0xf   : > { %s445_s26 = sshll.u32 %s159_s24, 3  ;;  %p744_p9 = pnand %p474_p8, %p49_p3 }
  0x10   : > { %s179_s28 = sand.u32 1, %s671_s17   ;;  %s188_s4 = scalar_lea.hbm %s812_s1, %s446_s25 }
  0x11   : > { %s183_s5 = scalar_lea.vmem [#allocation5], %s445_s26  ;;  %s190_s7 = sshll.u32 %s188_s4, 4  ;;  %s191_s7 = int_to_ptr.hbm [resolvable:$true] %s190_s7 }
  0x12   : > { %s192_s6 = sshll.u32 %s183_s5, 4  ;;  %p451_p10 = scmp.ge.s32.totalorder %s671_s17, 1  ;;  %s193_s6 = int_to_ptr.vmem [resolvable:$true] %s192_s6 }
  0x13   : > { %s180_s8 = scalar_lea.sflag [#allocation6], %s179_s28  ;;  %p217_p11 = scmp.lt.s32.totalorder %s671_s17, 3 }
  0x14   : > { %470 = dma.hbm_to_vmem [thread:$0]  (!%p744_p9), %s191_s7, 128, %s193_s6, %s180_s8  }
  0x15   : > { %p756_p12 = pnand %p451_p10, %p217_p11  ;;  %s168_s12 = scalar_lea.hbm %s811_s0, %s446_s25 }
  0x16   : > { %s163_s20 = scalar_lea.vmem [#allocation3], %s445_s26  ;;  %s170_s29 = sshll.u32 %s168_s12, 4  ;;  %s171_s29 = int_to_ptr.hbm [resolvable:$true] %s170_s29 }
  0x17   : > { %s172_s21 = sshll.u32 %s163_s20, 4  ;;  %s160_s30 = scalar_lea.sflag [#allocation4], %s159_s24  ;;  %s173_s21 = int_to_ptr.vmem [resolvable:$true] %s172_s21 }
  0x18   : > { %467 = dma.hbm_to_vmem [thread:$0]  (!%p744_p9), %s171_s29, 128, %s173_s21, %s160_s30  }
  0x19   : > { %s208_s5 = scalar_lea.hbm %s813_s2, %s446_s25  ;;  %s203_s6 = scalar_lea.vmem [#allocation7], %s445_s26 }
  0x1a   : > { %s212_s7 = sshll.u32 %s203_s6, 4  ;;  %s210_s18 = sshll.u32 %s208_s5, 4  ;;  %s213_s7 = int_to_ptr.vmem [resolvable:$true] %s212_s7  ;;  %s211_s18 = int_to_ptr.hbm [resolvable:$true] %s210_s18 }
  0x1b   : > { %473 = dma.hbm_to_vmem [thread:$0]  (!%p744_p9), %s211_s18, 128, %s213_s7, %s180_s8  }
  0x1c   : > { %221 = sbr.rel (%p756_p12) target bundleno = 187 (0xbb), region = 32  ;;  %s223_s10 = sand.u32 (!%p756_p12), 1, %s655_s13  }
  0x1d   : > { %s773_s24 = sshll.u32 (!%p756_p12), %s223_s10, 3  ;;  %s224_s11 = scalar_lea.sflag (!%p756_p12), [#allocation4], %s223_s10 }
  0x1e   : > { %s227_s12 = scalar_lea.vmem (!%p756_p12), [#allocation3], %s773_s24 }
  0x21   : > { %642 = dma.done.wait (%p734_p7), %s224_s11, 128  }
  0x22   : > { %644 = vsyncadd (%p734_p7), %s224_s11, 4294967168  ;;  %s819_s25 = sadd.s32 4294967295, %s671_s17   ;;  %s237_s27 = scalar_lea.vmem [#allocation5], %s773_s24 }
  0x23   : > { %s233_s18 = sand.u32 1, %s819_s25  }
  0x24   : > { %s234_s26 = scalar_lea.sflag [#allocation6], %s233_s18 }
  0x25   : > { %646 = dma.done.wait (%p734_p7), %s234_s26, 256  }
  0x26   : > { %648 = vsyncadd (%p734_p7), %s234_s26, 4294967040  ;;  %v289_v0 = vld [vmem:[%s227_s12] sm:$0xff]  ;;  %v290_v7 = vld [vmem:[%s237_s27] sm:$0xff]  ;;  %s247_s22 = scalar_lea.vmem [#allocation7], %s773_s24  ;;  %p280_p13 = scmp.lt.s32.totalorder %s663_s15, 1  ;;  %vm320_vm1 = vcmask 7168  }
  0x27   : > { %v295_v1 = vand.u32 2147483647, %v289_v0  ;;  %v292_v9 = vmax.f32 %v289_v0, 0.0  ;;  %v293_v10 = vmul.f32 %v290_v7, %v289_v0  ;;  %v291_v16 = vld [vmem:[%s247_s22] sm:$0xff] }
  0x28   : > { %s828_s15 = smov (!%p280_p13, %s663_s15), 1 }
  0x29   : > { %v296_v2 = vsub.f32 0.0, %v295_v1  ;;  %v294_v14 = vsub.f32 %v292_v9, %v293_v10  ;;  %s455_s8 = sshll.u32 %s828_s15, 3 }
  0x2a   : > { %s283_s21 = scalar_lea.vmem %s814_s3, %s455_s8 }
  0x2b   : > { %v297_v3 = vmul.f32 1.442695, %v296_v2 }
  0x2d   : > { %523 = vpow2.f32 %v297_v3 }
  0x33   : > { %v524_v4 = vpop.eup %523 }
  0x34   : > { %v299_v5 = vadd.f32 1.0, %v524_v4  ;;  %v302_v6 = vmul.f32 -0.5, %v524_v4  ;;  %v305_v11 = vand.u32 2147483647, %v524_v4 }
  0x36   : > { %525 = vlog2.f32 %v299_v5  ;;  %v303_v8 = vadd.f32 1.0, %v302_v6  ;;  %vm306_vm0 = vcmp.lt.f32.partialorder %v305_v11, 0.0004427343 }
  0x38   : > { %v304_v12 = vmul.f32 %v524_v4, %v303_v8 }
  0x3c   : > { %v526_v13 = vpop.eup %525 }
  0x3d   : > { %v301_v15 = vmul.f32 0.6931472, %v526_v13 }
  0x3f   : > { %v307_v17 = vsel %vm306_vm0, %v304_v12, %v301_v15 }
  0x40   : > { %v308_v18 = vadd.f32 %v307_v17, %v294_v14 }
  0x42   : > { %v309_v19 = vmul.f32 %v308_v18, %v291_v16 }
  0x44   : > { %317 = vadd.xlane.f32.xlu0 %v309_v19 }
  0xb7   : > { %v318_v20 = vpop.xlane.xlu0 %317 }
  0xb8   : > { %v319_v21 = vmul.f32 0.016666668, %v318_v20 }
  0xba   : > { %321 = vst.msk [vmem:[%s283_s21] sm:$0xff] %vm320_vm1, %v319_v21 }
  0xbb PF: > { %s19_s17 = sadd.s32 1, %s671_s17   ;;  %s820_s12 = smov %s655_s13 }
  0xbc   : > { %p16_p0 = scmp.ge.s32.totalorder %s19_s17, 4   ;;  %s821_s13 = smov %s659_s14 }
  0xbd   : > { %s822_s14 = smov %s740_s23  ;;  %s823_s15 = smov %s667_s16 }
  0xbe   : > { %s824_s16 = smov %s826_s19  ;;  %18 = sbr.rel (!%p16_p0) target bundleno = 6 (0x6), region = 104 }
  0xc3   :  { %341 = vsyncpa [#allocation4], 1 }
  0xc4   :  { %343 = vsyncpa [#allocation4 + $0x1], 1 }
  0xc5   :  { %344 = vsyncpa [#allocation6], 1 }
  0xc6   :  { %346 = vsyncpa [#allocation6 + $0x1], 1 }

</bundles_post_ra>
